<compile_context>
chip_gen: v7x
topology: tpu7x:2x2x1
jax: 0.10.0
libtpu: 0.0.40
codegen_flags: <defaults>
</compile_context>

<pallas_src>
import functools

import jax
import jax.numpy as jnp
from jax.experimental import pallas as pl
from jax.experimental.pallas import tpu as pltpu

_LANE = 128
_SUBLANE = 8


def _round_up(x, m):
    return (x + m - 1) // m * m


def _samepad_conv_kernel(x_ref, w_ref, b_ref, o_ref, *, ksize, dilation, l_tile):
    """One (batch, L-tile) grid step.

    x_ref : (Lp_in, Cin_p)    full padded sequence of this batch element (VMEM resident)
    w_ref : (K*Cin_p, Cout_p) tap-stacked weights
    b_ref : (1, Cout_p)
    o_ref : (l_tile, Cout_p)
    """
    j = pl.program_id(1)
    base = pl.multiple_of(j * l_tile, _SUBLANE)   # l_tile is a multiple of 8
    # Stack the K dilated taps along the channel (lane) axis -> one deep matmul.
    taps = [x_ref[pl.ds(base + k * dilation, l_tile), :] for k in range(ksize)]
    stacked = taps[0] if ksize == 1 else jnp.concatenate(taps, axis=-1)
    acc = jnp.dot(stacked, w_ref[...], preferred_element_type=jnp.float32)
    acc = acc + b_ref[...].astype(jnp.float32)
    o_ref[...] = acc.astype(o_ref.dtype)


def same_pad_conv(x, weight, bias, *, dilation=1, groups=1, l_tile=256):
    """SamePadConv forward.

    x      : (N, Cin, L)              (PyTorch Conv1d layout)
    weight : (Cout, Cin // groups, K) (PyTorch Conv1d weight layout)
    bias   : (Cout,)
    returns: (N, Cout, L)  == SamePadConv(...)(x)  (incl. even-rf trailing remove)
    """
    N, Cin, L = x.shape
    Cout, Cin_g, K = weight.shape
    rf = (K - 1) * dilation + 1
    pad = rf // 2

    # groups > 1: exact dense (block-diagonal) equivalent weight.
    # TODO(synk): grouped conv is lowered to an exact dense block-diagonal
    # matmul — correct, but wastes MXU work for large group counts.
    if groups > 1:
        og = Cout // groups
        w_dense = jnp.zeros((Cout, Cin, K), weight.dtype)
        for g in range(groups):
            w_dense = w_dense.at[g * og:(g + 1) * og,
                                 g * Cin_g:(g + 1) * Cin_g, :].set(
                weight[g * og:(g + 1) * og])
        weight = w_dense

    # Lane-dense channel padding (zero weights in padded slots -> exact result).
    cin_p = _round_up(Cin, _LANE)
    cout_p = _round_up(Cout, _LANE)

    # Channels-last activations with padded channels.
    x_nlc = jnp.transpose(x, (0, 2, 1))                       # (N, L, Cin)
    x_nlc = jnp.pad(x_nlc, ((0, 0), (0, 0), (0, cin_p - Cin)))

    # Output L-tiling (multiple of 8 sublanes).
    lt = _round_up(min(l_tile, _round_up(L, _SUBLANE)), _SUBLANE)
    lp_out = _round_up(L, lt)
    n_tiles = lp_out // lt

    # One padded activation copy per call: `pad` zeros left, enough zeros right
    # to cover the last tile's halo (zero padding is exact for a linear conv;
    # this also implements SamePadConv's even-rf `remove`, since exactly the
    # first L output rows are kept).
    lp_in = lp_out + rf - 1
    x_pad = jnp.pad(x_nlc, ((0, 0), (pad, lp_in - pad - L), (0, 0)))

    # (Cout, Cin, K) -> (K, Cin_p, Cout_p) -> (K*Cin_p, Cout_p) matching the
    # in-kernel tap stacking order (tap-major, channel-minor).
    w_kco = jnp.transpose(weight, (2, 1, 0))                  # (K, Cin, Cout)
    w_kco = jnp.pad(w_kco, ((0, 0), (0, cin_p - Cin), (0, cout_p - Cout)))
    w2d = w_kco.reshape(K * cin_p, cout_p)
    b2d = jnp.pad(bias, (0, cout_p - Cout)).reshape(1, cout_p)

    kernel = functools.partial(_samepad_conv_kernel, ksize=K,
                               dilation=dilation, l_tile=lt)

    itemsize = x_pad.dtype.itemsize
    est_vmem = (2 * lp_in * cin_p * itemsize                  # resident input (dbl-buf)
                + 2 * lt * cout_p * 4                         # streamed output tiles
                + 2 * K * cin_p * cout_p * w2d.dtype.itemsize # weights
                + lt * (K * cin_p + cout_p) * 4               # stacked operand + acc
                + (1 << 20))                                  # margin
    vmem_limit = int(min(64 * 1024 * 1024, max(8 * 1024 * 1024, est_vmem)))

    flops = 2 * N * lp_out * (K * cin_p) * cout_p
    bytes_accessed = (x_pad.size * itemsize
                      + w2d.size * w2d.dtype.itemsize
                      + N * lp_out * cout_p * itemsize)

    out = pl.pallas_call(
        kernel,
        out_shape=jax.ShapeDtypeStruct((N, lp_out, cout_p), x.dtype),
        grid=(N, n_tiles),
        in_specs=[
            pl.BlockSpec((None, lp_in, cin_p), lambda n, j: (n, 0, 0)),
            pl.BlockSpec((K * cin_p, cout_p), lambda n, j: (0, 0)),
            pl.BlockSpec((1, cout_p), lambda n, j: (0, 0)),
        ],
        out_specs=pl.BlockSpec((None, lt, cout_p), lambda n, j: (n, j, 0)),
        compiler_params=pltpu.CompilerParams(
            dimension_semantics=("parallel", "parallel"),
            vmem_limit_bytes=vmem_limit),
        cost_estimate=pl.CostEstimate(flops=flops, transcendentals=0,
                                      bytes_accessed=bytes_accessed),
    )(x_pad, w2d, b2d)

    out = out[:, :L, :Cout]                 # drop L-tile / channel padding
    return jnp.transpose(out, (0, 2, 1))    # back to (N, Cout, L)


def _reference_conv(x, w, b, dilation, groups):
    """Pure-XLA SamePadConv reference (for correctness checking only)."""
    rf = (w.shape[-1] - 1) * dilation + 1
    pad = rf // 2
    out = jax.lax.conv_general_dilated(
        x, w, window_strides=(1,), padding=[(pad, pad)],
        rhs_dilation=(dilation,), dimension_numbers=("NCH", "OIH", "NCH"),
        feature_group_count=groups)
    out = out + b[None, :, None]
    if rf % 2 == 0:
        out = out[:, :, :-1]
    return out


if __name__ == "__main__":
    key = jax.random.PRNGKey(0)
    kx, kw, kb, kw2, kb2 = jax.random.split(key, 5)

    N, C_IN, C_OUT, L, K, DIL = 2, 4, 8, 16, 3, 2

    x = jax.random.normal(kx, (N, C_IN, L), jnp.float32)            # torch NCL
    w = jax.random.normal(kw, (C_OUT, C_IN, K), jnp.float32) * 0.1
    b = jax.random.normal(kb, (C_OUT,), jnp.float32) * 0.1

    # odd receptive field, dilation=2
    out = same_pad_conv(x, w, b, dilation=DIL)
    out = jax.block_until_ready(out)
    assert out.shape == (N, C_OUT, L), out.shape
    assert jnp.all(jnp.isfinite(out))
    ref = _reference_conv(x, w, b, DIL, 1)
    assert jnp.allclose(out, ref, atol=2e-2, rtol=2e-2), \
        float(jnp.max(jnp.abs(out - ref)))

    # even receptive field (exercises the trailing `remove`) + grouped conv
    GROUPS = 2
    w2 = jax.random.normal(kw2, (C_OUT, C_IN // GROUPS, 2), jnp.float32) * 0.1
    b2 = jax.random.normal(kb2, (C_OUT,), jnp.float32) * 0.1
    out2 = same_pad_conv(x, w2, b2, dilation=1, groups=GROUPS)
    out2 = jax.block_until_ready(out2)
    assert out2.shape == (N, C_OUT, L), out2.shape
    ref2 = _reference_conv(x, w2, b2, 1, GROUPS)
    assert jnp.allclose(out2, ref2, atol=2e-2, rtol=2e-2), \
        float(jnp.max(jnp.abs(out2 - ref2)))

    print("KERNEL_OK")
</pallas_src>

<mosaic_0001>
module attributes {stable_mosaic.version = 11 : i64} {
  func.func @_samepad_conv_kernel(%arg0: i32, %arg1: i32, %arg2: memref<1x20x128xf32, #tpu.memory_space<vmem>>, %arg3: memref<384x128xf32, #tpu.memory_space<vmem>>, %arg4: memref<1x128xf32, #tpu.memory_space<vmem>>, %arg5: memref<1x16x128xf32, #tpu.memory_space<vmem>>) attributes {dimension_semantics = [#tpu.dimension_semantics<parallel>, #tpu.dimension_semantics<parallel>], iteration_bounds = array<i64: 2, 1>, scalar_prefetch = 0 : i64, scratch_operands = 0 : i64, tpu.core_type = #tpu.core_type<tc>, window_params = [{transform_indices = @transform_0, window_bounds = array<i64: 1, 20, 128>}, {pipeline_mode = #tpu.pipeline_mode<synchronous>, transform_indices = @transform_1, window_bounds = array<i64: 384, 128>}, {pipeline_mode = #tpu.pipeline_mode<synchronous>, transform_indices = @transform_2, window_bounds = array<i64: 1, 128>}, {transform_indices = @transform_3, window_bounds = array<i64: 1, 16, 128>}]} {
    %c16_i32 = arith.constant 16 : i32
    %0 = arith.muli %arg1, %c16_i32 : i32
    %1 = tpu.assume_multiple %0, 8 : i32
    %c0_i32 = arith.constant 0 : i32
    %2 = arith.addi %1, %c0_i32 : i32
    %c0 = arith.constant 0 : index
    %3 = arith.index_cast %2 : i32 to index
    %c0_0 = arith.constant 0 : index
    %4 = vector.load %arg2[%c0, %3, %c0_0] : memref<1x20x128xf32, #tpu.memory_space<vmem>>, vector<1x16x128xf32>
    %5 = vector.shape_cast %4 : vector<1x16x128xf32> to vector<16x128xf32>
    %c2_i32 = arith.constant 2 : i32
    %6 = arith.addi %1, %c2_i32 : i32
    %c0_1 = arith.constant 0 : index
    %7 = arith.index_cast %6 : i32 to index
    %c0_2 = arith.constant 0 : index
    %8 = vector.load %arg2[%c0_1, %7, %c0_2] : memref<1x20x128xf32, #tpu.memory_space<vmem>>, vector<1x16x128xf32>
    %9 = vector.shape_cast %8 : vector<1x16x128xf32> to vector<16x128xf32>
    %c4_i32 = arith.constant 4 : i32
    %10 = arith.addi %1, %c4_i32 : i32
    %c0_3 = arith.constant 0 : index
    %11 = arith.index_cast %10 : i32 to index
    %c0_4 = arith.constant 0 : index
    %12 = vector.load %arg2[%c0_3, %11, %c0_4] : memref<1x20x128xf32, #tpu.memory_space<vmem>>, vector<1x16x128xf32>
    %13 = vector.shape_cast %12 : vector<1x16x128xf32> to vector<16x128xf32>
    %14 = tpu.concatenate %5, %9, %13 in 1 : vector<16x128xf32>, vector<16x128xf32>, vector<16x128xf32> -> vector<16x384xf32>
    %c0_5 = arith.constant 0 : index
    %c0_6 = arith.constant 0 : index
    %15 = vector.load %arg3[%c0_5, %c0_6] : memref<384x128xf32, #tpu.memory_space<vmem>>, vector<384x128xf32>
    %cst = arith.constant dense<0.000000e+00> : vector<16x128xf32>
    %16 = tpu.matmul %14, %15, %cst {dimension_numbers = #tpu.dot_dimension_numbers<[1], [0], [0], [1], [0, 0, 1, 1], [], []>} : vector<16x384xf32>, vector<384x128xf32>, vector<16x128xf32> -> vector<16x128xf32>
    %c0_7 = arith.constant 0 : index
    %c0_8 = arith.constant 0 : index
    %17 = vector.load %arg4[%c0_7, %c0_8] : memref<1x128xf32, #tpu.memory_space<vmem>>, vector<1x128xf32>
    %18 = vector.broadcast %17 : vector<1x128xf32> to vector<16x128xf32>
    %19 = arith.addf %16, %18 : vector<16x128xf32>
    %c0_9 = arith.constant 0 : index
    %c0_10 = arith.constant 0 : index
    %c0_11 = arith.constant 0 : index
    %20 = vector.load %arg5[%c0_9, %c0_10, %c0_11] : memref<1x16x128xf32, #tpu.memory_space<vmem>>, vector<1x16x128xf32>
    %21 = vector.shape_cast %20 : vector<1x16x128xf32> to vector<16x128xf32>
    %22 = vector.shape_cast %19 : vector<16x128xf32> to vector<1x16x128xf32>
    tpu.vector_store %arg5[%c0_9, %c0_10, %c0_11], %22 {strides = array<i32>} : memref<1x16x128xf32, #tpu.memory_space<vmem>>, vector<1x16x128xf32>,
    return
  }
  func.func @transform_0(%arg0: i32, %arg1: i32) -> (i32, i32, i32) {
    %c0_i32 = arith.constant 0 : i32
    %c0_i32_0 = arith.constant 0 : i32
    %c0_i32_1 = arith.constant 0 : i32
    return %arg0, %c0_i32, %c0_i32_0 : i32, i32, i32
  }
  func.func @transform_1(%arg0: i32, %arg1: i32) -> (i32, i32) {
    %c0_i32 = arith.constant 0 : i32
    %c0_i32_0 = arith.constant 0 : i32
    %c0_i32_1 = arith.constant 0 : i32
    return %c0_i32, %c0_i32_0 : i32, i32
  }
  func.func @transform_2(%arg0: i32, %arg1: i32) -> (i32, i32) {
    %c0_i32 = arith.constant 0 : i32
    %c0_i32_0 = arith.constant 0 : i32
    %c0_i32_1 = arith.constant 0 : i32
    return %c0_i32, %c0_i32_0 : i32, i32
  }
  func.func @transform_3(%arg0: i32, %arg1: i32) -> (i32, i32, i32) {
    %c0_i32 = arith.constant 0 : i32
    %c0_i32_0 = arith.constant 0 : i32
    return %arg0, %arg1, %c0_i32 : i32, i32, i32
  }
}

</mosaic_0001>

<bundles_post_ra>
// kernel: tpu_custom_call.1
= control target key start
LH: loop header
LB: loop body
LE: loop exit
PB: predicated region body
PF: predicated region fallthrough
CT: control target
= control target key end

     0   :  { %8 = vsyncpa [#allocation3], 0  ;;  %s1080_s0 = inlined_call_operand.vmem [shape: f32[2,20,128], index: 0, kind: input, shape index: {}]   ;;  %s1081_s1 = inlined_call_operand.hbm [shape: f32[384,128], index: 1, kind: input, shape index: {}]   ;;  %s1082_s2 = inlined_call_operand.vmem [shape: f32[1,128], index: 2, kind: input, shape index: {}]   ;;  %s1083_s3 = inlined_call_operand.hbm [shape: f32[2,16,128], index: 3, kind: output, shape index: {}]  }
   0x1   :  { %9 = vsyncpa [#allocation4], 0 }
   0x2   :  { %11 = vsyncpa [#allocation4 + $0x1], 0  ;;  %s911_s12 = smov 0   ;;  %s913_s13 = smov 0  }
   0x3   :  { %s915_s14 = smov 0   ;;  %s917_s15 = smov 0  }
   0x4   :  { %s919_s16 = smov 0   ;;  %s921_s17 = smov 0  }
   0x5 LB: > { %s527_s18 = sadd.s32 4294967295, %s883_s17   ;;  %s528_s19 = sadd.s32 4294967294, %s883_s17   ;;  %s883_s17 = sphi %s921_s17, %s17_s17   ;;  %s879_s16 = sphi %s919_s16, %s1101_s16   ;;  %s875_s15 = sphi %s917_s15, %s1100_s15   ;;  %s871_s14 = sphi %s915_s14, %s1099_s14   ;;  %s867_s13 = sphi %s913_s13, %s1098_s13   ;;  %s863_s12 = sphi %s911_s12, %s1097_s12  }
   0x6   : > { %s29_s20 = sadd.s32 1, %s879_s16  ;;  %s106_s21 = sadd.s32 1, %s871_s14 }
   0x7   : > { %p31_p0 = scmp.ge.s32.totalorder %s29_s20, 2  ;;  %p116_p1 = scmp.ne.s32.totalorder %s871_s14, %s867_s13 }
   0x8   : > { %p117_p2 = scmp.eq.s32.totalorder %s527_s18, 1  ;;  %p122_p3 = scmp.ne.s32.totalorder %s867_s13, %s863_s12 }
   0x9   : > { %s1103_s20 = smov (%p31_p0, %s29_s20), 0  ;;  %p123_p5 = scmp.eq.s32.totalorder %s528_s19, 1 }
   0xa   : > { %p951_p4 = por %p117_p2, %p116_p1  ;;  %s101_s23 = ssub.s32 %s879_s16, %s1103_s20 }
   0xb   : > { %p529_p6 = scmp.ge.s32.totalorder %s883_s17, 1  ;;  %p104_p7 = scmp.eq.s32.totalorder %s101_s23, 0 }
   0xc   : > { %s1088_s22 = scalar_select %p951_p4, 1, 0 }
   0xd   : > { %p958_p8 = por %p123_p5, %p122_p3  ;;  %p130_p9 = scmp.lt.s32.totalorder %s883_s17, 3 }
   0xe   : > { %s964_s25 = scalar_select %p104_p7, %s871_s14, %s106_s21  }
   0xf   : > { %s1089_s24 = scalar_select %p958_p8, 1, 0 }
  0x10   : > { %p966_p10 = pnand %p529_p6, %p130_p9  ;;  %p970_p11 = scmp.eq.s32.totalorder %s527_s18, 0 }
  0x11   : > { %s885_s28 = smov [#allocation2]   ;;  %s773_s6 = scalar_lea.hbm %s1081_s1, 6144 }
  0x12   : > { %s1090_s26 = scalar_select %p966_p10, 1, 0 }
  0x13   : > { %s1091_s27 = scalar_select %p970_p11, 1, 0 }
  0x14   : > { %p709_p12 = pneg %p966_p10  ;;  %s142_s29 = sshll.u32 %s885_s28, 4  ;;  %s143_s29 = int_to_ptr.vmem [resolvable:$true] %s142_s29 }
  0x15   : > { %p774_p0 = scmp.ne.s32.totalorder %s1081_s1, %s773_s6  ;;  %p780_p5 = scmp.lt.u32.totalorder %s773_s6, %s1081_s1 }
  0x16   : > { %p978_p13 = pnand %p970_p11, %p709_p12 }
  0x18   : > { %p775_p1 = pneg %p978_p13 }
  0x1a   : > { %p776_p2 = pnand %p775_p1, %p774_p0 }
  0x1c   : > { %p777_p3 = pneg %p776_p2 }
  0x1e   : > { %p782_p6 = pnand %p780_p5, %p777_p3 }
  0x20   : > { %785 = shalt.err (!%p782_p6)
}
  0x21   : > { %s786_s11 = scalar_lea.vmem %s143_s29, 6144  ;;  %p794_p8 = scmp.lt.s32.totalorder %s143_s29, %s143_s29 }
  0x22   : > { %p787_p7 = scmp.ne.s32.totalorder %s143_s29, %s786_s11  ;;  %p795_p4 = scmp.lt.s32.totalorder %s786_s11, %s786_s11 }
  0x24   : > { %p789_p9 = pnand %p787_p7, %p775_p1  ;;  %p796_p11 = por %p795_p4, %p794_p8 }
  0x26   : > { %p790_p12 = pneg %p789_p9 }
  0x28   : > { %p797_p10 = pnand %p796_p11, %p790_p12 }
  0x2a   : > { %800 = shalt.err (!%p797_p10)
}
  0x2b   : > { %s886_s18 = smov 128   ;;  %s887_s19 = smov 8  }
  0x2c   : > { %712 = dma.hbm_to_vmem [thread:$0]  (!%p978_p13), %s1081_s1, 6144, %s143_s29, [#allocation3], %s886_s18, %s886_s18, %s887_s19  }
  0x2d   : > { %p1093_p0 = scmp.ne.s32.totalorder %s1090_s26, 0 }
  0x2e   : > { %p1094_p2 = scmp.ne.s32.totalorder (!%p1093_p0), %s1091_s27, 0 }
  0x2f   : > { %169 = sbr.rel (%p1093_p0) target bundleno = 328 (0x148), region = 32 }
  0x36   : > { %854 = dma.done.wait (%p1094_p2), [#allocation3], 6144  }
  0x37   : > { %856 = vsyncadd (%p1094_p2), [#allocation3], 4294961152  ;;  %v227_v0 = vld [vmem:[#allocation2 + $0x80] sm:$0xff]  ;;  %v228_v1 = vld [vmem:[#allocation2 + $0x88] sm:$0xff]  ;;  %p193_p4 = scmp.lt.s32.totalorder %s875_s15, 1  ;;  %s190_s4 = sand.u32 1, %s867_s13  }
  0x38   : > { %v211_v2 = vld [vmem:[#allocation2] sm:$0xff]  ;;  %v638_v3 = vpack.c.bf16 %v228_v1, %v227_v0  ;;  %v212_v4 = vld [vmem:[#allocation2 + $0x8] sm:$0xff]  ;;  %v229_v5 = vld [vmem:[#allocation2 + $0x90] sm:$0xff]  ;;  %s534_s7 = sshll.u32 %s190_s4, 4  ;;  %s546_s10 = sshll.u32 %s875_s15, 8 }
  0x39   : > { %v230_v6 = vld [vmem:[#allocation2 + $0x98] sm:$0xff]  ;;  %v640_v7 = vpack.c.bf16 %v212_v4, %v211_v2  ;;  %v243_v9 = vld [vmem:[#allocation2 + $0x100] sm:$0xff]  ;;  %v244_v10 = vld [vmem:[#allocation2 + $0x108] sm:$0xff]  ;;  %s1008_s26 = scalar_select %p193_p4, %s875_s15, 1 }
  0x3a   : > { %v642_v8 = vpack.c.bf16 %v230_v6, %v229_v5  ;;  %v213_v11 = vld [vmem:[#allocation2 + $0x10] sm:$0xff]  ;;  %639 = vmatprep.subr.bf16.mxu0 %v638_v3  ;;  %v670_v12 = vpack.c.bf16 %v244_v10, %v243_v9  ;;  %v214_v13 = vld [vmem:[#allocation2 + $0x18] sm:$0xff]  ;;  %v231_v14 = vld [vmem:[#allocation2 + $0xa0] sm:$0xff]  ;;  %s192_s8 = scalar_lea.vmem [#allocation5], %s534_s7  ;;  %s1032_s19 = scalar_lea.hbm %s1083_s3, %s546_s10 }
  0x3b   : > { %v232_v15 = vld [vmem:[#allocation2 + $0xa8] sm:$0xff]  ;;  %641 = vmatpush3.bf16.msra.mxu0 %v640_v7  ;;  %v644_v16 = vpack.c.bf16 %v214_v13, %v213_v11  ;;  %v245_v17 = vld [vmem:[#allocation2 + $0x110] sm:$0xff]  ;;  %v246_v18 = vld [vmem:[#allocation2 + $0x118] sm:$0xff]  ;;  %s702_s27 = smul.u32 24, %s1008_s26  ;;  %s434_s9 = sshll.u32 %s192_s8, 4  ;;  %s1027_s9 = int_to_ptr.vmem [resolvable:$true] %s434_s9 }
  0x3c   : > { %643 = vmatprep.subr.bf16.mxu0 %v642_v8  ;;  %671 = vmatprep.subr.bf16.mxu1 %v670_v12  ;;  %v646_v19 = vpack.c.bf16 %v232_v15, %v231_v14  ;;  %v674_v20 = vpack.c.bf16 %v246_v18, %v245_v17  ;;  %v215_v21 = vld [vmem:[#allocation2 + $0x20] sm:$0xff]  ;;  %v216_v22 = vld [vmem:[#allocation2 + $0x28] sm:$0xff]  ;;  %v233_v23 = vld [vmem:[#allocation2 + $0xb0] sm:$0xff]  ;;  %s1034_s21 = scalar_lea.sflag [#allocation4], %s190_s4  ;;  %s801_s23 = scalar_lea.vmem %s1027_s9, 256 }
  0x3d   : > { %673 = vmatpush3.bf16.msra.mxu1 %v670_v12  ;;  %v234_v24 = vld [vmem:[#allocation2 + $0xb8] sm:$0xff]  ;;  %v247_v25 = vld [vmem:[#allocation2 + $0x120] sm:$0xff]  ;;  %v248_v26 = vld [vmem:[#allocation2 + $0x128] sm:$0xff]  ;;  %v648_v28 = vpack.c.bf16 %v216_v22, %v215_v21  ;;  %s1014_s30 = scalar_lea.vmem %s1080_s0, %s702_s27  ;;  %p802_p8 = scmp.ne.s32.totalorder %s1027_s9, %s801_s23 }
  0x3e   : > { %675 = vmatprep.subr.bf16.mxu1 %v674_v20  ;;  %v678_v27 = vpack.c.bf16 %v248_v26, %v247_v25  ;;  %v249_v29 = vld [vmem:[#allocation2 + $0x130] sm:$0xff]  ;;  %v250_v30 = vld [vmem:[#allocation2 + $0x138] sm:$0xff]  ;;  %v650_v31 = vpack.c.bf16 %v234_v24, %v233_v23  ;;  %v235_v34 = vld [vmem:[#allocation2 + $0xc0] sm:$0xff]  ;;  %p1095_p10 = scmp.ne.s32.totalorder %s1088_s22, 0  ;;  %s888_s15 = smov [#allocation5]  }
  0x3f   : > { %645 = vmatpush3.bf16.msra.mxu0 %v644_v16  ;;  %v217_v32 = vld [vmem:[#allocation2 + $0x30] sm:$0xff]  ;;  %v218_v33 = vld [vmem:[#allocation2 + $0x38] sm:$0xff]  ;;  %v236_v35 = vld [vmem:[#allocation2 + $0xc8] sm:$0xff]  ;;  %v682_v36 = vpack.c.bf16 %v250_v30, %v249_v29  ;;  %s805_s26 = sshll.u32 %s888_s15, 4  ;;  %s806_s26 = int_to_ptr.vmem [resolvable:$false] %s805_s26 }
  0x40   : > { %647 = vmatprep.subr.bf16.mxu0 %v646_v19  ;;  %v652_v37 = vpack.c.bf16 %v218_v33, %v217_v32  ;;  %v251_v38 = vld [vmem:[#allocation2 + $0x140] sm:$0xff]  ;;  %v252_v39 = vld [vmem:[#allocation2 + $0x148] sm:$0xff]  ;;  %v654_v40 = vpack.c.bf16 %v236_v35, %v235_v34  ;;  %v237_v43 = vld [vmem:[#allocation2 + $0xd0] sm:$0xff]  ;;  %p803_p11 = pnand %p802_p8, %p1095_p10  ;;  %s807_s27 = scalar_lea.vmem %s806_s26, 512 }
  0x41   : > { %677 = vmatpush3.bf16.msra.mxu1 %v674_v20  ;;  %v219_v41 = vld [vmem:[#allocation2 + $0x40] sm:$0xff]  ;;  %v220_v42 = vld [vmem:[#allocation2 + $0x48] sm:$0xff]  ;;  %v238_v44 = vld [vmem:[#allocation2 + $0xd8] sm:$0xff]  ;;  %v686_v45 = vpack.c.bf16 %v252_v39, %v251_v38  ;;  %p808_p1 = scmp.lt.s32.totalorder %s1027_s9, %s806_s26  ;;  %p809_p3 = scmp.lt.s32.totalorder %s807_s27, %s801_s23 }
  0x42   : > { %679 = vmatprep.subr.bf16.mxu1 %v678_v27  ;;  %v536_v46 = vld [vmem:[%s1014_s30 + $0x2] sm:$0xff]  ;;  %v656_v47 = vpack.c.bf16 %v220_v42, %v219_v41  ;;  %v658_v50 = vpack.c.bf16 %v238_v44, %v237_v43  ;;  %v239_v54 = vld [vmem:[#allocation2 + $0xe0] sm:$0xff]  ;;  %v240_v55 = vld [vmem:[#allocation2 + $0xe8] sm:$0xff]  ;;  %p804_p13 = pneg %p803_p11 }
  0x43   : > { %649 = vmatpush3.bf16.msra.mxu0 %v648_v28  ;;  %v253_v48 = vld [vmem:[#allocation2 + $0x150] sm:$0xff]  ;;  %v254_v49 = vld [vmem:[#allocation2 + $0x158] sm:$0xff]  ;;  %330 = vmatprep.mubr.f32.mxu0 %v536_v46  ;;  %v255_v58 = vld [vmem:[#allocation2 + $0x160] sm:$0xff]  ;;  %v662_v60 = vpack.c.bf16 %v240_v55, %v239_v54  ;;  %p810_p5 = por %p809_p3, %p808_p1 }
  0x44   : > { %651 = vmatprep.subr.bf16.mxu0 %v650_v31  ;;  %v221_v51 = vld [vmem:[#allocation2 + $0x50] sm:$0xff]  ;;  %v222_v52 = vld [vmem:[#allocation2 + $0x58] sm:$0xff]  ;;  %v690_v56 = vpack.c.bf16 %v254_v49, %v253_v48  ;;  %v256_v59 = vld [vmem:[#allocation2 + $0x168] sm:$0xff] }
  0x45   : > { %681 = vmatpush3.bf16.msra.mxu1 %v678_v27  ;;  %v538_v53 = vld [vmem:[%s1014_s30 + $0x4] sm:$0xff]  ;;  %v660_v57 = vpack.c.bf16 %v222_v52, %v221_v51  ;;  %v223_v61 = vld [vmem:[#allocation2 + $0x60] sm:$0xff]  ;;  %v224_v62 = vld [vmem:[#allocation2 + $0x68] sm:$0xff]  ;;  %v694_v1 = vpack.c.bf16 %v256_v59, %v255_v58  ;;  %p811_p6 = pnand %p810_p5, %p804_p13 }
  0x46   : > { %683 = vmatprep.subr.bf16.mxu1 %v682_v36  ;;  %635 = vmatprep.mubr.f32.mxu1 %v538_v53  ;;  %v241_v63 = vld [vmem:[#allocation2 + $0xf0] sm:$0xff]  ;;  %v242_v0 = vld [vmem:[#allocation2 + $0xf8] sm:$0xff]  ;;  %v664_v2 = vpack.c.bf16 %v224_v62, %v223_v61 }
  0x47   : > { %653 = vmatpush3.bf16.msra.mxu0 %v652_v37  ;;  %v257_v3 = vld [vmem:[#allocation2 + $0x170] sm:$0xff]  ;;  %v258_v4 = vld [vmem:[#allocation2 + $0x178] sm:$0xff]  ;;  %v666_v5 = vpack.c.bf16 %v242_v0, %v241_v63 }
  0x48   : > { %655 = vmatprep.subr.bf16.mxu0 %v654_v40  ;;  %v225_v6 = vld [vmem:[#allocation2 + $0x70] sm:$0xff]  ;;  %v226_v7 = vld [vmem:[#allocation2 + $0x78] sm:$0xff]  ;;  %v698_v8 = vpack.c.bf16 %v258_v4, %v257_v3 }
  0x49   : > { %685 = vmatpush3.bf16.msra.mxu1 %v682_v36  ;;  %v668_v9 = vpack.c.bf16 %v226_v7, %v225_v6  ;;  %v201_v10 = vld [vmem:[%s1014_s30] sm:$0xff]  ;;  %v537_v11 = vld [vmem:[%s1014_s30 + $0xa] sm:$0xff] }
  0x4a   : > { %687 = vmatprep.subr.bf16.mxu1 %v686_v45  ;;  %v539_v12 = vld [vmem:[%s1014_s30 + $0xc] sm:$0xff]  ;;  %v540_v16 = vld [vmem:[%s1082_s2] ss:$0 sm:$0xff] }
  0x4b   : > { %657 = vmatpush3.bf16.msra.mxu0 %v656_v47  ;;  %v202_v13 = vld [vmem:[%s1014_s30 + $0x8] sm:$0xff] }
  0x4c   : > { %659 = vmatprep.subr.bf16.mxu0 %v658_v50 }
  0x4d   : > { %689 = vmatpush3.bf16.msra.mxu1 %v686_v45 }
  0x4e   : > { %691 = vmatprep.subr.bf16.mxu1 %v690_v56 }
  0x4f   : > { %661 = vmatpush3.bf16.msra.mxu0 %v660_v57 }
  0x50   : > { %663 = vmatprep.subr.bf16.mxu0 %v662_v60 }
  0x51   : > { %693 = vmatpush3.bf16.msra.mxu1 %v690_v56 }
  0x52   : > { %695 = vmatprep.subr.bf16.mxu1 %v694_v1 }
  0x53   : > { %665 = vmatpush3.bf16.msra.mxu0 %v664_v2 }
  0x54   : > { %667 = vmatprep.subr.bf16.mxu0 %v666_v5 }
  0x55   : > { %697 = vmatpush3.bf16.msra.mxu1 %v694_v1 }
  0x56   : > { %699 = vmatprep.subr.bf16.mxu1 %v698_v8 }
  0x57   : > { %669 = vmatpush3.bf16.msra.mxu0 %v668_v9 }
  0x59   : > { %701 = vmatpush3.bf16.msra.mxu1 %v698_v8 }
  0x5a   : > { %331 = vmatmul.mubr.f32.vlgmr.msra.gmra.mrb[0].mxu0 %v201_v10 }
  0x5b   : > { %335 = vmatprep.mubr.f32.mxu0 %v537_v11 }
  0x5c   : > { %636 = vmatmul.mubr.f32.vlgmr.msra.gmra.mrb[0].mxu1 %v539_v12 }
  0x5e   : > { %336 = vmatmul.mubr.f32.gmra.mrb[2].mxu0 %v202_v13 }
 0x12d   : > { %v579_v14 = vpop.f32.mrb[0].mxu0 }
 0x12e   : > { %v580_v15 = vpop.f32.mrb[1].mxu0 }
 0x12f   : > { %v581_v17 = vadd.f32 %v580_v15, %v579_v14  ;;  %v637_v18 = vpop.f32.mrb[0].mxu1 }
 0x130   : > { %v407_v19 = vpop.f32.mrb[1].mxu1 }
 0x131   : > { %v582_v20 = vpop.f32.mrb[2].mxu0  ;;  %v333_v21 = vadd.f32 %v581_v17, %v540_v16 }
 0x132   : > { %v583_v22 = vpop.f32.mrb[3].mxu0 }
 0x133   : > { %v584_v23 = vadd.f32 %v583_v22, %v582_v20  ;;  %v408_v24 = vadd.f32 %v407_v19, %v333_v21 }
 0x135   : > { %v338_v25 = vadd.f32 %v584_v23, %v540_v16  ;;  %416 = vst [vmem:[%s192_s8] sm:$0xff] %v408_v24 }
 0x137   : > { %v413_v26 = vadd.f32 %v637_v18, %v338_v25 }
 0x139   : > { %417 = vst [vmem:[%s192_s8 + $0x8] sm:$0xff] %v413_v26 }
 0x13a   : > { %814 = shalt.err (!%p811_p6)
}
 0x13b   : > { %s815_s28 = scalar_lea.hbm %s1032_s19, 256  ;;  %s819_s4 = scalar_lea.hbm %s1083_s3, 512 }
 0x13c   : > { %p816_p7 = scmp.ne.s32.totalorder %s1032_s19, %s815_s28  ;;  %p820_p0 = scmp.lt.u32.totalorder %s1032_s19, %s1083_s3 }
 0x13d   : > { %p821_p2 = scmp.lt.u32.totalorder %s819_s4, %s815_s28  ;;  %p823_p8 = scmp.lt.u32.totalorder %s815_s28, %s1032_s19 }
 0x13e   : > { %p817_p9 = pnand %p816_p7, %p1095_p10 }
 0x13f   : > { %p822_p4 = por %p821_p2, %p820_p0 }
 0x140   : > { %p818_p12 = pneg %p817_p9 }
 0x141   : > { %p824_p11 = por %p823_p8, %p822_p4 }
 0x143   : > { %p825_p13 = pnand %p824_p11, %p818_p12 }
 0x145   : > { %828 = shalt.err (!%p825_p13)
}
 0x146   : > { %s889_s7 = smov 128   ;;  %s890_s8 = smov 8  }
 0x147   : > { %707 = dma.vmem_to_hbm [thread:$0]  (%p1095_p10), %s1027_s9, 256, %s1032_s19, %s1034_s21, %s889_s7, %s889_s7, %s890_s8  }
 0x148 PF: > { %p719_p1 = scmp.ge.s32.totalorder %s883_s17, 2  ;;  %s449_s10 = sand.u32 1, %s863_s12  }
 0x149   : > { %p1096_p3 = scmp.ne.s32.totalorder %s1089_s24, 0  ;;  %s450_s11 = scalar_lea.sflag [#allocation4], %s449_s10 }
 0x14b   : > { %p714_p5 = pnand %p719_p1, %p1096_p3 }
 0x14d   : > { %858 = dma.done.wait (!%p714_p5), %s450_s11, 256  }
 0x14e   : > { %860 = vsyncadd (!%p714_p5), %s450_s11, 4294967040  ;;  %s17_s17 = sadd.s32 1, %s883_s17   ;;  %s1097_s12 = smov %s867_s13 }
 0x14f   : > { %p14_p6 = scmp.ge.s32.totalorder %s17_s17, 4   ;;  %s1098_s13 = smov %s871_s14 }
 0x150   : > { %s1099_s14 = smov %s964_s25  ;;  %s1100_s15 = smov %s879_s16 }
 0x151   : > { %s1101_s16 = smov %s1103_s20  ;;  %16 = sbr.rel (!%p14_p6) target bundleno = 5 (0x5), region = 75 }
 0x158   :  { %455 = vsyncpa [#allocation3], 1 }
 0x159   :  { %457 = vsyncpa [#allocation3 + $0x1], 1 }
 0x15a   :  { %458 = vsyncpa [#allocation4], 1 }
 0x15b   :  { %460 = vsyncpa [#allocation4 + $0x1], 1 }

</bundles_post_ra>
